<compile_context>
chip_gen: v7x
topology: tpu7x:2x2x1
jax: 0.10.0
libtpu: 0.0.40
codegen_flags: <defaults>
</compile_context>

<pallas_src>
import math

import jax
import jax.numpy as jnp
from jax.experimental import pallas as pl
from jax.experimental.pallas import tpu as pltpu

H_MAX = 0.05  # same constant as ode_solve()


# ---------------------------------------------------------------------------
# Static step plan + batch-invariant propagator algebra (hoisted out of kernel)
# ---------------------------------------------------------------------------

def _build_step_plan(t):
    """Static (n_steps, h) per time segment, mirroring ode_solve()."""
    t = [float(v) for v in t]
    plan = []
    for i in range(len(t) - 1):
        n_steps = int(math.ceil(abs(t[i + 1] - t[i]) / H_MAX))
        h = (t[i + 1] - t[i]) / n_steps
        plan.append((n_steps, h))
    return tuple(plan)


def _segment_propagators(wz_f32, h, n_steps, dz):
    """For one segment: A = M^n and S = I + M + ... + M^(n-1), M = I + h*Wz.

    n_steps is a static Python int -> unrolls at trace time into O(log n)
    tiny dz x dz matmuls (exponentiation by squaring).
    """
    f32 = jnp.float32
    eye = jnp.eye(dz, dtype=f32)
    m = eye + f32(h) * wz_f32
    a = s = None            # accumulated (M^k, geometric sum of k terms)
    p, g = m, eye           # 2^j-step block: (M^(2^j), sum_{i<2^j} M^i)
    nrem = n_steps
    while True:
        if nrem & 1:
            if a is None:
                a, s = p, g
            else:
                s = s @ p + g
                a = a @ p
        nrem >>= 1
        if not nrem:
            break
        g = g @ p + g
        p = p @ p
    return a, s


def _fold_propagators(step_plan, wz, wu, b, dz):
    """Collapse the whole Euler chain to  z_T = z0 @ P + u @ B_eff + c_eff.

    Per segment the affine step is z -> z @ A + (h * fu) @ S with fu = u@Wu + b.
    Composing segments:  P <- P @ A,  F <- F @ A + h*S,  so
        z_T = z0 @ P + fu @ F = z0 @ P + u @ (Wu @ F) + b @ F.
    Everything here is batch-invariant and computed once (plain JAX / XLA).
    """
    f32 = jnp.float32
    wz_f = wz.astype(f32)
    P = jnp.eye(dz, dtype=f32)
    F = jnp.zeros((dz, dz), dtype=f32)
    for n_steps, h in step_plan:
        a, s = _segment_propagators(wz_f, h, n_steps, dz)
        F = F @ a + f32(h) * s
        P = P @ a
    b_eff = wu.astype(f32) @ F          # (du, dz)
    c_eff = b.astype(f32) @ F           # (1, dz)
    w_stacked = jnp.concatenate([P, b_eff], axis=0)   # (dz+du, dz)
    return w_stacked, c_eff


# ---------------------------------------------------------------------------
# Kernels: one fused MXU matmul + broadcast add per batch tile
# ---------------------------------------------------------------------------

def _kernel_plain(w_ref, c_ref, zu_ref, out_ref):
    """out[tile, dz] = zu[tile, dz+du] @ W[dz+du, dz] + c[1, dz]."""
    f32 = jnp.float32
    acc = jnp.dot(zu_ref[...].astype(f32), w_ref[...].astype(f32),
                  preferred_element_type=f32)
    out_ref[...] = (acc + c_ref[...].astype(f32)).astype(out_ref.dtype)


def _kernel_lane_dense(wt_ref, ct_ref, zut_ref, out_ref):
    """Transposed / lane-dense: out[dz, tile] = W^T @ zu^T + c^T (batch on lanes)."""
    f32 = jnp.float32
    acc = jnp.dot(wt_ref[...].astype(f32), zut_ref[...].astype(f32),
                  preferred_element_type=f32)
    out_ref[...] = (acc + ct_ref[...].astype(f32)).astype(out_ref.dtype)


# ---------------------------------------------------------------------------
# Wrapper
# ---------------------------------------------------------------------------

def _round_up(x, m):
    return ((x + m - 1) // m) * m


def neural_ode_forward(z0, u, wz, wu, b, t=(0.0, 1.0), *,
                       batch_tile=None, lane_dense=None):
    """Pallas implementation of NeuralODE.forward(z0, u, t)[-1].

    wz: (dz, dz), wu: (du, dz) stored as [in, out]; b: (1, dz) folded bias.
    """
    step_plan = _build_step_plan(t)
    bs, dz = z0.shape
    du = u.shape[1]

    # Batch-invariant propagators, computed ONCE (not per tile / per core).
    w_stacked, c_eff = _fold_propagators(step_plan, wz, wu, b, dz)

    if lane_dense is None:
        lane_dense = bs >= 128   # only worth transposing once lanes can fill

    if lane_dense:
        if batch_tile is None:
            if bs <= 256:
                batch_tile = 128                       # >=2 blocks at bs>=256 (v7x: 2 TCs)
            else:
                batch_tile = min(512, _round_up(pl.cdiv(bs, 2), 128))
        grid = (pl.cdiv(bs, batch_tile),)

        # Batch on the 128-lane axis; propagators VMEM-resident whole-array.
        zut = jnp.concatenate([z0, u], axis=1).T       # (dz+du, bs)
        wt = w_stacked.T                               # (dz, dz+du)
        ct = c_eff.T                                   # (dz, 1)

        out_t = pl.pallas_call(
            _kernel_lane_dense,
            out_shape=jax.ShapeDtypeStruct((dz, bs), z0.dtype),
            grid=grid,
            in_specs=[
                pl.BlockSpec(memory_space=pltpu.MemorySpace.VMEM),   # W^T (resident)
                pl.BlockSpec(memory_space=pltpu.MemorySpace.VMEM),   # c^T (resident)
                pl.BlockSpec((dz + du, batch_tile), lambda i: (0, i)),
            ],
            out_specs=pl.BlockSpec((dz, batch_tile), lambda i: (0, i)),
            compiler_params=pltpu.CompilerParams(
                dimension_semantics=("parallel",)),
        )(wt, ct, zut)
        return out_t.T                                 # restore (bs, dz) module layout

    # Small-batch path: single block, output equals full array dims.
    if batch_tile is None:
        batch_tile = bs
    grid = (pl.cdiv(bs, batch_tile),)
    zu = jnp.concatenate([z0, u], axis=1)              # (bs, dz+du)

    return pl.pallas_call(
        _kernel_plain,
        out_shape=jax.ShapeDtypeStruct((bs, dz), z0.dtype),
        grid=grid,
        in_specs=[
            pl.BlockSpec(memory_space=pltpu.MemorySpace.VMEM),       # W (resident)
            pl.BlockSpec(memory_space=pltpu.MemorySpace.VMEM),       # c (resident)
            pl.BlockSpec((batch_tile, dz + du), lambda i: (i, 0)),
        ],
        out_specs=pl.BlockSpec((batch_tile, dz), lambda i: (i, 0)),
        compiler_params=pltpu.CompilerParams(
            dimension_semantics=("parallel",)),
    )(w_stacked, c_eff, zu)


# ---------------------------------------------------------------------------
# Pure-JAX reference mirroring ODEAdjoint.forward / ode_solve exactly
# ---------------------------------------------------------------------------

def neural_ode_reference(z0, u, wz, wu, b, t=(0.0, 1.0)):
    z = z0.astype(jnp.float32)
    uf = u.astype(jnp.float32)
    t = [float(v) for v in t]
    for i in range(len(t) - 1):
        n_steps = int(math.ceil(abs(t[i + 1] - t[i]) / H_MAX))
        h = (t[i + 1] - t[i]) / n_steps
        for _ in range(n_steps):
            f = z @ wz + uf @ wu + b
            z = z + h * f
    return z.astype(z0.dtype)


if __name__ == "__main__":
    key = jax.random.PRNGKey(0)
    (k_z, k_u, k_wz, k_wu, k_bz, k_bu,
     k_z2, k_u2, k_z3, k_u3) = jax.random.split(key, 10)

    dz, du = 32, 16   # latent dim, input dim

    # Deterministic "Linear" params (PyTorch-style uniform(-1/sqrt(in), 1/sqrt(in))),
    # stored pre-transposed as [in, out]; the two biases folded into one vector.
    wz = jax.random.uniform(k_wz, (dz, dz), jnp.float32,
                            minval=-1.0 / math.sqrt(dz), maxval=1.0 / math.sqrt(dz))
    wu = jax.random.uniform(k_wu, (du, dz), jnp.float32,
                            minval=-1.0 / math.sqrt(du), maxval=1.0 / math.sqrt(du))
    bz = jax.random.uniform(k_bz, (1, dz), jnp.float32,
                            minval=-1.0 / math.sqrt(dz), maxval=1.0 / math.sqrt(dz))
    bu = jax.random.uniform(k_bu, (1, dz), jnp.float32,
                            minval=-1.0 / math.sqrt(du), maxval=1.0 / math.sqrt(du))
    b = bz + bu

    # --- Case 1: small batch (plain layout), default t=(0,1) -> 20 Euler steps.
    bs = 8
    z0 = jax.random.normal(k_z, (bs, dz), dtype=jnp.float32)
    u = jax.random.normal(k_u, (bs, du), dtype=jnp.float32)
    t = (0.0, 1.0)

    out = jax.block_until_ready(neural_ode_forward(z0, u, wz, wu, b, t))
    ref = neural_ode_reference(z0, u, wz, wu, b, t)
    assert out.shape == (bs, dz)
    assert jnp.allclose(out, ref, atol=5e-5, rtol=5e-5)

    # --- Case 1b: multiple time segments.
    t2 = (0.0, 0.45, 1.0)
    out2 = jax.block_until_ready(neural_ode_forward(z0, u, wz, wu, b, t2))
    ref2 = neural_ode_reference(z0, u, wz, wu, b, t2)
    assert jnp.allclose(out2, ref2, atol=5e-5, rtol=5e-5)

    # --- Case 2: lane-dense transposed path, 2 batch blocks (both v7x TCs busy).
    bsb = 256
    z0b = jax.random.normal(k_z2, (bsb, dz), dtype=jnp.float32)
    ub = jax.random.normal(k_u2, (bsb, du), dtype=jnp.float32)
    outb = jax.block_until_ready(neural_ode_forward(z0b, ub, wz, wu, b, t))
    refb = neural_ode_reference(z0b, ub, wz, wu, b, t)
    assert outb.shape == (bsb, dz)
    assert jnp.allclose(outb, refb, atol=5e-5, rtol=5e-5)

    # --- Case 3: ragged last block (bs not a multiple of the 128-col tile);
    #     verifies padded columns cannot leak into valid output.
    bsc = 200
    z0c = jax.random.normal(k_z3, (bsc, dz), dtype=jnp.float32)
    uc = jax.random.normal(k_u3, (bsc, du), dtype=jnp.float32)
    outc = jax.block_until_ready(neural_ode_forward(z0c, uc, wz, wu, b, t))
    refc = neural_ode_reference(z0c, uc, wz, wu, b, t)
    assert outc.shape == (bsc, dz)
    assert jnp.allclose(outc, refc, atol=5e-5, rtol=5e-5)

    print("KERNEL_OK")
</pallas_src>

<mosaic_0001>
module attributes {stable_mosaic.version = 11 : i64} {
  func.func @_kernel_plain(%arg0: i32, %arg1: memref<48x32xf32, #tpu.memory_space<vmem>>, %arg2: memref<1x32xf32, #tpu.memory_space<vmem>>, %arg3: memref<8x48xf32, #tpu.memory_space<vmem>>, %arg4: memref<8x32xf32, #tpu.memory_space<vmem>>) attributes {dimension_semantics = [#tpu.dimension_semantics<parallel>], iteration_bounds = array<i64: 1>, scalar_prefetch = 0 : i64, scratch_operands = 0 : i64, tpu.core_type = #tpu.core_type<tc>, window_params = [{pipeline_mode = #tpu.pipeline_mode<synchronous>, transform_indices = @transform_0, window_bounds = array<i64: 48, 32>}, {pipeline_mode = #tpu.pipeline_mode<synchronous>, transform_indices = @transform_1, window_bounds = array<i64: 1, 32>}, {transform_indices = @transform_2, window_bounds = array<i64: 8, 48>}, {transform_indices = @transform_3, window_bounds = array<i64: 8, 32>}]} {
    %c0 = arith.constant 0 : index
    %c0_0 = arith.constant 0 : index
    %0 = vector.load %arg3[%c0, %c0_0] : memref<8x48xf32, #tpu.memory_space<vmem>>, vector<8x48xf32>
    %c0_1 = arith.constant 0 : index
    %c0_2 = arith.constant 0 : index
    %1 = vector.load %arg1[%c0_1, %c0_2] : memref<48x32xf32, #tpu.memory_space<vmem>>, vector<48x32xf32>
    %cst = arith.constant dense<0.000000e+00> : vector<8x32xf32>
    %2 = tpu.matmul %0, %1, %cst {dimension_numbers = #tpu.dot_dimension_numbers<[1], [0], [0], [1], [0, 0, 1, 1], [], []>} : vector<8x48xf32>, vector<48x32xf32>, vector<8x32xf32> -> vector<8x32xf32>
    %c0_3 = arith.constant 0 : index
    %c0_4 = arith.constant 0 : index
    %3 = vector.load %arg2[%c0_3, %c0_4] : memref<1x32xf32, #tpu.memory_space<vmem>>, vector<1x32xf32>
    %4 = vector.broadcast %3 : vector<1x32xf32> to vector<8x32xf32>
    %5 = arith.addf %2, %4 : vector<8x32xf32>
    %c0_5 = arith.constant 0 : index
    %c0_6 = arith.constant 0 : index
    %6 = vector.load %arg4[%c0_5, %c0_6] : memref<8x32xf32, #tpu.memory_space<vmem>>, vector<8x32xf32>
    tpu.vector_store %arg4[%c0_5, %c0_6], %5 {strides = array<i32>} : memref<8x32xf32, #tpu.memory_space<vmem>>, vector<8x32xf32>,
    return
  }
  func.func @transform_0(%arg0: i32) -> (i32, i32) {
    %c0_i32 = arith.constant 0 : i32
    %c0_i32_0 = arith.constant 0 : i32
    %c0_i32_1 = arith.constant 0 : i32
    return %c0_i32, %c0_i32_0 : i32, i32
  }
  func.func @transform_1(%arg0: i32) -> (i32, i32) {
    %c0_i32 = arith.constant 0 : i32
    %c0_i32_0 = arith.constant 0 : i32
    %c0_i32_1 = arith.constant 0 : i32
    return %c0_i32, %c0_i32_0 : i32, i32
  }
  func.func @transform_2(%arg0: i32) -> (i32, i32) {
    %c0_i32 = arith.constant 0 : i32
    %c0_i32_0 = arith.constant 0 : i32
    return %arg0, %c0_i32 : i32, i32
  }
  func.func @transform_3(%arg0: i32) -> (i32, i32) {
    %c0_i32 = arith.constant 0 : i32
    %c0_i32_0 = arith.constant 0 : i32
    return %arg0, %c0_i32 : i32, i32
  }
}

</mosaic_0001>

<bundles_post_ra>
// kernel: tpu_custom_call.1
= control target key start
LH: loop header
LB: loop body
LE: loop exit
PB: predicated region body
PF: predicated region fallthrough
CT: control target
= control target key end

     0   :  { %v180_v3 = vmov 0.0|0.0   ;;  %vm181_vm0 = vmmov 0   ;;  %v182_v6 = vmov 0.0   ;;  %s240_s0 = inlined_call_operand.vmem [shape: f32[48,32], index: 0, kind: input, shape index: {}]   ;;  %s241_s1 = inlined_call_operand.vmem [shape: f32[1,32], index: 1, kind: input, shape index: {}]   ;;  %s242_s2 = inlined_call_operand.vmem [shape: f32[8,48], index: 2, kind: input, shape index: {}]   ;;  %s243_s3 = inlined_call_operand.hbm [shape: f32[8,32], index: 3, kind: output, shape index: {}]  }
   0x1   :  { %v16_v0 = vld [vmem:[%s240_s0] sm:$0xff]  ;;  %v17_v1 = vld [vmem:[%s240_s0 + $0x8] sm:$0xff]  ;;  %v18_v2 = vld [vmem:[%s240_s0 + $0x10] sm:$0xff]  ;;  %143 = vmatprep.subr.bf16.mxu0 %v180_v3  ;;  %140 = vmatprep.mubr.msk.f32.mxu0 %vm181_vm0, %v182_v6 }
   0x2   :  { %v144_v4 = vpack.c.bf16 %v17_v1, %v16_v0  ;;  %v19_v5 = vld [vmem:[%s240_s0 + $0x18] sm:$0xff] }
   0x3   :  { %8 = vsyncpa [#allocation3], 0  ;;  %v147_v7 = vpack.c.bf16 %v19_v5, %v18_v2  ;;  %v20_v8 = vld [vmem:[%s240_s0 + $0x20] sm:$0xff]  ;;  %v21_v9 = vld [vmem:[%s240_s0 + $0x28] sm:$0xff]  ;;  %vm29_vm1 = vcmask 392192   ;;  %s183_s28 = smov [#allocation2]  }
   0x4   :  { %145 = vmatpush3.bf16.msra.mxu0 %v144_v4  ;;  %v150_v10 = vpack.c.bf16 %v21_v9, %v20_v8  ;;  %v15_v11 = vld [vmem:[%s242_s2] sm:$0xff]  ;;  %s111_s29 = sshll.u32 %s183_s28, 4  ;;  %vm103_vm2 = vcmask 261120   ;;  %s112_s29 = int_to_ptr.vmem [resolvable:$true] %s111_s29 }
   0x5   :  { %146 = vmatprep.subr.bf16.mxu0 %v180_v3  ;;  %v119_v12 = vld [vmem:[%s241_s1] ss:$0 sm:$0xff]  ;;  %s156_s0 = scalar_lea.vmem %s112_s29, 128  ;;  %p161_p1 = scmp.lt.s32.totalorder %s112_s29, %s112_s29 }
   0x6   :  { %p157_p0 = scmp.ne.s32.totalorder %s112_s29, %s156_s0  ;;  %p162_p2 = scmp.lt.s32.totalorder %s156_s0, %s156_s0 }
   0x8   :  { %148 = vmatpush3.bf16.msra.mxu0 %v147_v7  ;;  %p163_p3 = por %p162_p2, %p161_p1 }
   0x9   :  { %149 = vmatprep.subr.bf16.mxu0 %v180_v3 }
   0xa   :  { %p164_p4 = pnand %p163_p3, %p157_p0 }
   0xc   :  { %151 = vmatpush3.bf16.msra.mxu0 %v150_v10 }
   0xf   :  { %141 = vmatmul.mubr.msk.f32.vlgmr.msra.gmra.mrb[0].mxu0 %vm29_vm1, %v15_v11 }
  0xe2   :  { %v99_v13 = vpop.f32.mrb[0].mxu0 }
  0xe3   :  { %v100_v14 = vadd.f32 %v119_v12, %v99_v13  ;;  %v142_v15 = vpop.f32.mrb[1].mxu0 }
  0xe5   :  { %104 = vst.msk [vmem:[#allocation2] sm:$0xff] %vm103_vm2, %v100_v14 }
  0xe6   :  { %167 = shalt.err (!%p164_p4)
}
  0xe7   :  { %s168_s4 = scalar_lea.hbm %s243_s3, 128 }
  0xe8   :  { %p169_p5 = scmp.ne.s32.totalorder %s243_s3, %s168_s4  ;;  %p172_p6 = scmp.lt.u32.totalorder %s168_s4, %s243_s3 }
  0xea   :  { %p174_p7 = pnand %p172_p6, %p169_p5 }
  0xec   :  { %177 = shalt.err (!%p174_p7)
}
  0xed   :  { %114 = dma.vmem_to_hbm [thread:$0]  %s112_s29, 128, %s243_s3, [#allocation3]  }
  0xee   :  { %178 = dma.done.wait [#allocation3], 128  }
  0xef   :  { %179 = vsyncadd [#allocation3], 4294967168 }
  0xf0   :  { %118 = vsyncpa [#allocation3], 1 }

</bundles_post_ra>
